<compile_context>
chip_gen: v7x
topology: tpu7x:2x2x1
jax: 0.10.0
libtpu: 0.0.40
codegen_flags: <defaults>
</compile_context>

<pallas_src>
import functools
import numpy as np
import jax
import jax.numpy as jnp
from jax import lax
from jax.experimental import pallas as pl
from jax.experimental.pallas import tpu as pltpu

_NBUF = 16  # DMA-semaphore ring depth (gathers kept in flight per grid step)


def _make_position_encoding(max_len: int, d_model: int) -> np.ndarray:
    """Same math as StatementEncoder._create_position_encoding (NumPy, deterministic)."""
    assert d_model % 2 == 0, "sinusoidal positional encoding assumes even d_model"
    position = np.arange(max_len, dtype=np.float32)[:, None]
    div_term = np.exp(np.arange(0, d_model, 2, dtype=np.float32) * (-np.log(10000.0) / d_model))
    pe = np.zeros((max_len, d_model), dtype=np.float32)
    pe[:, 0::2] = np.sin(position * div_term)
    pe[:, 1::2] = np.cos(position * div_term)
    return pe


def _encoder_kernel(B, S, V, TB, TS, ids_ref, emb_hbm, pos_ref, out_ref, rows, sems):
    # ids_ref : SMEM (B*S,) int32   -- scalar-prefetched, flattened token ids
    # emb_hbm : HBM  (V, D)         -- embedding table left in place (pl.ANY), row-gathered via DMA
    # pos_ref : VMEM (TS, D) f32    -- positional-encoding tile for this sequence block
    # out_ref : VMEM (TB, TS, D)    -- output block for (row-block i, seq-block j)
    # rows    : VMEM (TB*TS, D)     -- gather destination scratch
    # sems    : DMA semaphore ring (_NBUF,)
    i = pl.program_id(0)                 # batch-row block
    j = pl.program_id(1)                 # sequence tile
    base_row = i * TB
    base_col = j * TS
    n_tok = TB * TS                      # gathers this step (static)
    depth = min(_NBUF, n_tok)            # in-flight window
    last_flat = B * S - 1

    def token_of(n):
        # n (python int or traced scalar) -> clamped token id for this block.
        r = n // TS
        t = n - r * TS
        flat = jnp.minimum((base_row + r) * S + (base_col + t), last_flat)  # ragged-block guard
        tok = ids_ref[flat]
        return jnp.minimum(jnp.maximum(tok, 0), V - 1)  # OOB-id guard before the DMA

    def start(n, tok):
        pltpu.make_async_copy(
            emb_hbm.at[pl.ds(tok, 1), :],     # (1, D) row of the table in HBM
            rows.at[pl.ds(n, 1), :],          # (1, D) row of the VMEM scratch
            sems.at[n % _NBUF],
        ).start()

    def wait(n):
        pltpu.make_async_copy(                # reconstructed descriptor: size is what matters
            emb_hbm.at[pl.ds(0, 1), :],
            rows.at[pl.ds(n, 1), :],
            sems.at[n % _NBUF],
        ).wait()

    # Prime the ring: keep `depth` row-gather DMAs in flight at all times.
    for n in range(depth):
        start(n, token_of(n))

    if depth < n_tok:
        def body(n, carry):
            nxt = n + depth
            tok_nxt = token_of(nxt)           # scalar SMEM read *before* the wait
            wait(n)
            @pl.when(nxt < n_tok)
            def _():
                start(nxt, tok_nxt)           # reuses the slot we just waited on
            return carry
    else:
        def body(n, carry):
            wait(n)
            return carry

    lax.fori_loop(0, n_tok, body, 0)

    # One vectorized add + one whole-block store (reshape is a leading-dim split: layout-free
    # when TS is a multiple of 8, which the tile chooser prefers).
    gathered = rows[...].reshape(out_ref.shape).astype(jnp.float32)
    out_ref[...] = (gathered + pos_ref[...][None, :, :]).astype(out_ref.dtype)


def _choose_tiles(B: int, S: int):
    """Pick (TB, TS): enough tokens per step to amortize step cost, bounded VMEM, >=2 row blocks."""
    if S <= 1024:
        TS = S
    else:
        TS = 512                              # bound per-step VMEM (v7x: 64 MiB physical)
        while S % TS != 0 and TS > 8:
            TS //= 2
        if S % TS != 0:
            TS = S
    tokens_target = 256                       # ~256 gathers per grid step
    TB = max(1, min(B, max(1, tokens_target // TS)))
    if B > 1:
        TB = min(TB, (B + 1) // 2)            # keep >=2 row blocks -> both v7x TensorCores busy
    return TB, TS


def statement_encoder(token_ids, embedding_table, pos_encoding_full):
    """Pallas equivalent of StatementEncoder.forward: embedding(x) + pos_encoding[:S]."""
    B, S = token_ids.shape
    V, D = embedding_table.shape
    assert S <= pos_encoding_full.shape[0], "sequence longer than precomputed positional table"

    pos = pos_encoding_full[:S].astype(jnp.float32)          # glue: plain-JAX slice, keep f32
    out_dtype = jnp.promote_types(embedding_table.dtype, jnp.float32)
    ids_flat = token_ids.reshape(-1).astype(jnp.int32)       # 1-D ids: no 2-D SMEM padding

    TB, TS = _choose_tiles(B, S)
    grid = (pl.cdiv(B, TB), pl.cdiv(S, TS))

    grid_spec = pltpu.PrefetchScalarGridSpec(
        num_scalar_prefetch=1,                                # token ids land in SMEM
        grid=grid,
        in_specs=[
            pl.BlockSpec(memory_space=pl.ANY),                # table stays in HBM (no auto-DMA)
            pl.BlockSpec((TS, D), lambda i, j, ids: (j, 0)),  # positional tile in VMEM
        ],
        out_specs=pl.BlockSpec((TB, TS, D), lambda i, j, ids: (i, j, 0)),
        scratch_shapes=[
            pltpu.VMEM((TB * TS, D), embedding_table.dtype),  # gathered embedding rows
            pltpu.SemaphoreType.DMA((_NBUF,)),                # bounded DMA-semaphore ring
        ],
    )

    emb_item = jnp.dtype(embedding_table.dtype).itemsize
    out_item = jnp.dtype(out_dtype).itemsize
    rows_bytes = TB * TS * D * emb_item
    pos_bytes = TS * D * 4
    out_bytes = TB * TS * D * out_item
    needed = rows_bytes + 2 * (pos_bytes + out_bytes)         # scratch + double-buffered blocks
    vmem_limit = int(min(96 * 2**20, max(8 * 2**20, 2 * needed + (1 << 20))))

    cost = pl.CostEstimate(
        flops=B * S * D,                                      # the adds
        transcendentals=0,
        bytes_accessed=B * S * 4                              # ids
        + B * S * D * emb_item                                # gathered rows
        + S * D * 4                                           # positional table
        + B * S * D * out_item,                               # output
    )

    return pl.pallas_call(
        functools.partial(_encoder_kernel, B, S, V, TB, TS),
        out_shape=jax.ShapeDtypeStruct((B, S, D), out_dtype),
        grid_spec=grid_spec,
        compiler_params=pltpu.CompilerParams(
            dimension_semantics=("parallel", "parallel"),
            vmem_limit_bytes=vmem_limit,
        ),
        cost_estimate=cost,
    )(ids_flat, embedding_table, pos)


if __name__ == "__main__":
    # Module-default vocab/embed_dim; small batch/seq. Table never enters VMEM, so the full
    # 50000-row vocab is cheap to keep.
    vocab_size, embed_dim = 50000, 64
    batch, seq = 2, 8
    max_len = 1000

    key = jax.random.PRNGKey(0)
    k_emb, k_ids = jax.random.split(key)

    # nn.Embedding default init is N(0, 1); deterministic synthetic weights.
    embedding_table = jax.random.normal(k_emb, (vocab_size, embed_dim), dtype=jnp.float32)
    pos_encoding = jnp.asarray(_make_position_encoding(max_len, embed_dim))
    token_ids = jax.random.randint(k_ids, (batch, seq), 0, vocab_size, dtype=jnp.int32)

    out = statement_encoder(token_ids, embedding_table, pos_encoding)
    out = jax.block_until_ready(out)

    # Pure-JAX reference of the PyTorch forward: embedding(x) + pos_encoding[:S]
    ref = embedding_table[token_ids] + pos_encoding[:seq][None, :, :]
    np.testing.assert_allclose(np.asarray(out), np.asarray(ref), rtol=1e-6, atol=1e-6)

    print("KERNEL_OK")
</pallas_src>

<mosaic_0001>
module attributes {stable_mosaic.version = 11 : i64} {
  func.func @_encoder_kernel(%arg0: i32, %arg1: i32, %arg2: memref<16xi32, #tpu.memory_space<smem>>, %arg3: memref<50000x64xf32, #tpu.memory_space<any>>, %arg4: memref<8x64xf32, #tpu.memory_space<vmem>>, %arg5: memref<1x8x64xf32, #tpu.memory_space<vmem>>, %arg6: memref<8x64xf32, #tpu.memory_space<vmem>>, %arg7: memref<16x!tpu.dma_semaphore, #tpu.memory_space<semaphore_mem>>) attributes {dimension_semantics = [#tpu.dimension_semantics<parallel>, #tpu.dimension_semantics<parallel>], iteration_bounds = array<i64: 2, 1>, scalar_prefetch = 1 : i64, scratch_operands = 2 : i64, tpu.core_type = #tpu.core_type<tc>, window_params = [{}, {transform_indices = @transform_1, window_bounds = array<i64: 8, 64>}, {transform_indices = @transform_2, window_bounds = array<i64: 1, 8, 64>}]} {
    %c1_i32 = arith.constant 1 : i32
    %0 = arith.muli %arg0, %c1_i32 : i32
    %c8_i32 = arith.constant 8 : i32
    %1 = arith.muli %arg1, %c8_i32 : i32
    %c0_i32 = arith.constant 0 : i32
    %2 = arith.addi %0, %c0_i32 : i32
    %c8_i32_0 = arith.constant 8 : i32
    %3 = arith.muli %2, %c8_i32_0 : i32
    %c0_i32_1 = arith.constant 0 : i32
    %4 = arith.addi %1, %c0_i32_1 : i32
    %5 = arith.addi %3, %4 : i32
    %c15_i32 = arith.constant 15 : i32
    %6 = arith.minsi %5, %c15_i32 : i32
    %7 = arith.index_cast %6 : i32 to index
    %8 = memref.load %arg2[%7] : memref<16xi32, #tpu.memory_space<smem>>
    %c0_i32_2 = arith.constant 0 : i32
    %9 = arith.maxsi %8, %c0_i32_2 : i32
    %c49999_i32 = arith.constant 49999 : i32
    %10 = arith.minsi %9, %c49999_i32 : i32
    %c0_i32_3 = arith.constant 0 : i32
    %c0_i32_4 = arith.constant 0 : i32
    %11 = tpu.memref_slice %arg3[%10, %c0_i32_4] : memref<50000x64xf32, #tpu.memory_space<any>> -> memref<1x64xf32, #tpu.memory_space<any>>
    %c0_i32_5 = arith.constant 0 : i32
    %c0_i32_6 = arith.constant 0 : i32
    %12 = tpu.memref_slice %arg6[%c0_i32_5, %c0_i32_6] : memref<8x64xf32, #tpu.memory_space<vmem>> -> memref<1x64xf32, #tpu.memory_space<vmem>>
    %13 = tpu.memref_slice %arg7[%c0_i32_3] : memref<16x!tpu.dma_semaphore, #tpu.memory_space<semaphore_mem>> -> memref<1x!tpu.dma_semaphore, #tpu.memory_space<semaphore_mem>>
    %14 = tpu.memref_squeeze %13 : memref<1x!tpu.dma_semaphore, #tpu.memory_space<semaphore_mem>> -> memref<!tpu.dma_semaphore, #tpu.memory_space<semaphore_mem>>
    tpu.enqueue_dma source(%11 : memref<1x64xf32, #tpu.memory_space<any>>) target(%12 : memref<1x64xf32, #tpu.memory_space<vmem>>) target_semaphore(%14 : memref<!tpu.dma_semaphore, #tpu.memory_space<semaphore_mem>>)
    %c0_i32_7 = arith.constant 0 : i32
    %15 = arith.addi %0, %c0_i32_7 : i32
    %c8_i32_8 = arith.constant 8 : i32
    %16 = arith.muli %15, %c8_i32_8 : i32
    %c1_i32_9 = arith.constant 1 : i32
    %17 = arith.addi %1, %c1_i32_9 : i32
    %18 = arith.addi %16, %17 : i32
    %c15_i32_10 = arith.constant 15 : i32
    %19 = arith.minsi %18, %c15_i32_10 : i32
    %20 = arith.index_cast %19 : i32 to index
    %21 = memref.load %arg2[%20] : memref<16xi32, #tpu.memory_space<smem>>
    %c0_i32_11 = arith.constant 0 : i32
    %22 = arith.maxsi %21, %c0_i32_11 : i32
    %c49999_i32_12 = arith.constant 49999 : i32
    %23 = arith.minsi %22, %c49999_i32_12 : i32
    %c1_i32_13 = arith.constant 1 : i32
    %c0_i32_14 = arith.constant 0 : i32
    %24 = tpu.memref_slice %arg3[%23, %c0_i32_14] : memref<50000x64xf32, #tpu.memory_space<any>> -> memref<1x64xf32, #tpu.memory_space<any>>
    %c1_i32_15 = arith.constant 1 : i32
    %c0_i32_16 = arith.constant 0 : i32
    %25 = tpu.memref_slice %arg6[%c1_i32_15, %c0_i32_16] : memref<8x64xf32, #tpu.memory_space<vmem>> -> memref<1x64xf32, #tpu.memory_space<vmem>>
    %26 = tpu.memref_slice %arg7[%c1_i32_13] : memref<16x!tpu.dma_semaphore, #tpu.memory_space<semaphore_mem>> -> memref<1x!tpu.dma_semaphore, #tpu.memory_space<semaphore_mem>>
    %27 = tpu.memref_squeeze %26 : memref<1x!tpu.dma_semaphore, #tpu.memory_space<semaphore_mem>> -> memref<!tpu.dma_semaphore, #tpu.memory_space<semaphore_mem>>
    tpu.enqueue_dma source(%24 : memref<1x64xf32, #tpu.memory_space<any>>) target(%25 : memref<1x64xf32, #tpu.memory_space<vmem>>) target_semaphore(%27 : memref<!tpu.dma_semaphore, #tpu.memory_space<semaphore_mem>>)
    %c0_i32_17 = arith.constant 0 : i32
    %28 = arith.addi %0, %c0_i32_17 : i32
    %c8_i32_18 = arith.constant 8 : i32
    %29 = arith.muli %28, %c8_i32_18 : i32
    %c2_i32 = arith.constant 2 : i32
    %30 = arith.addi %1, %c2_i32 : i32
    %31 = arith.addi %29, %30 : i32
    %c15_i32_19 = arith.constant 15 : i32
    %32 = arith.minsi %31, %c15_i32_19 : i32
    %33 = arith.index_cast %32 : i32 to index
    %34 = memref.load %arg2[%33] : memref<16xi32, #tpu.memory_space<smem>>
    %c0_i32_20 = arith.constant 0 : i32
    %35 = arith.maxsi %34, %c0_i32_20 : i32
    %c49999_i32_21 = arith.constant 49999 : i32
    %36 = arith.minsi %35, %c49999_i32_21 : i32
    %c2_i32_22 = arith.constant 2 : i32
    %c0_i32_23 = arith.constant 0 : i32
    %37 = tpu.memref_slice %arg3[%36, %c0_i32_23] : memref<50000x64xf32, #tpu.memory_space<any>> -> memref<1x64xf32, #tpu.memory_space<any>>
    %c2_i32_24 = arith.constant 2 : i32
    %c0_i32_25 = arith.constant 0 : i32
    %38 = tpu.memref_slice %arg6[%c2_i32_24, %c0_i32_25] : memref<8x64xf32, #tpu.memory_space<vmem>> -> memref<1x64xf32, #tpu.memory_space<vmem>>
    %39 = tpu.memref_slice %arg7[%c2_i32_22] : memref<16x!tpu.dma_semaphore, #tpu.memory_space<semaphore_mem>> -> memref<1x!tpu.dma_semaphore, #tpu.memory_space<semaphore_mem>>
    %40 = tpu.memref_squeeze %39 : memref<1x!tpu.dma_semaphore, #tpu.memory_space<semaphore_mem>> -> memref<!tpu.dma_semaphore, #tpu.memory_space<semaphore_mem>>
    tpu.enqueue_dma source(%37 : memref<1x64xf32, #tpu.memory_space<any>>) target(%38 : memref<1x64xf32, #tpu.memory_space<vmem>>) target_semaphore(%40 : memref<!tpu.dma_semaphore, #tpu.memory_space<semaphore_mem>>)
    %c0_i32_26 = arith.constant 0 : i32
    %41 = arith.addi %0, %c0_i32_26 : i32
    %c8_i32_27 = arith.constant 8 : i32
    %42 = arith.muli %41, %c8_i32_27 : i32
    %c3_i32 = arith.constant 3 : i32
    %43 = arith.addi %1, %c3_i32 : i32
    %44 = arith.addi %42, %43 : i32
    %c15_i32_28 = arith.constant 15 : i32
    %45 = arith.minsi %44, %c15_i32_28 : i32
    %46 = arith.index_cast %45 : i32 to index
    %47 = memref.load %arg2[%46] : memref<16xi32, #tpu.memory_space<smem>>
    %c0_i32_29 = arith.constant 0 : i32
    %48 = arith.maxsi %47, %c0_i32_29 : i32
    %c49999_i32_30 = arith.constant 49999 : i32
    %49 = arith.minsi %48, %c49999_i32_30 : i32
    %c3_i32_31 = arith.constant 3 : i32
    %c0_i32_32 = arith.constant 0 : i32
    %50 = tpu.memref_slice %arg3[%49, %c0_i32_32] : memref<50000x64xf32, #tpu.memory_space<any>> -> memref<1x64xf32, #tpu.memory_space<any>>
    %c3_i32_33 = arith.constant 3 : i32
    %c0_i32_34 = arith.constant 0 : i32
    %51 = tpu.memref_slice %arg6[%c3_i32_33, %c0_i32_34] : memref<8x64xf32, #tpu.memory_space<vmem>> -> memref<1x64xf32, #tpu.memory_space<vmem>>
    %52 = tpu.memref_slice %arg7[%c3_i32_31] : memref<16x!tpu.dma_semaphore, #tpu.memory_space<semaphore_mem>> -> memref<1x!tpu.dma_semaphore, #tpu.memory_space<semaphore_mem>>
    %53 = tpu.memref_squeeze %52 : memref<1x!tpu.dma_semaphore, #tpu.memory_space<semaphore_mem>> -> memref<!tpu.dma_semaphore, #tpu.memory_space<semaphore_mem>>
    tpu.enqueue_dma source(%50 : memref<1x64xf32, #tpu.memory_space<any>>) target(%51 : memref<1x64xf32, #tpu.memory_space<vmem>>) target_semaphore(%53 : memref<!tpu.dma_semaphore, #tpu.memory_space<semaphore_mem>>)
    %c0_i32_35 = arith.constant 0 : i32
    %54 = arith.addi %0, %c0_i32_35 : i32
    %c8_i32_36 = arith.constant 8 : i32
    %55 = arith.muli %54, %c8_i32_36 : i32
    %c4_i32 = arith.constant 4 : i32
    %56 = arith.addi %1, %c4_i32 : i32
    %57 = arith.addi %55, %56 : i32
    %c15_i32_37 = arith.constant 15 : i32
    %58 = arith.minsi %57, %c15_i32_37 : i32
    %59 = arith.index_cast %58 : i32 to index
    %60 = memref.load %arg2[%59] : memref<16xi32, #tpu.memory_space<smem>>
    %c0_i32_38 = arith.constant 0 : i32
    %61 = arith.maxsi %60, %c0_i32_38 : i32
    %c49999_i32_39 = arith.constant 49999 : i32
    %62 = arith.minsi %61, %c49999_i32_39 : i32
    %c4_i32_40 = arith.constant 4 : i32
    %c0_i32_41 = arith.constant 0 : i32
    %63 = tpu.memref_slice %arg3[%62, %c0_i32_41] : memref<50000x64xf32, #tpu.memory_space<any>> -> memref<1x64xf32, #tpu.memory_space<any>>
    %c4_i32_42 = arith.constant 4 : i32
    %c0_i32_43 = arith.constant 0 : i32
    %64 = tpu.memref_slice %arg6[%c4_i32_42, %c0_i32_43] : memref<8x64xf32, #tpu.memory_space<vmem>> -> memref<1x64xf32, #tpu.memory_space<vmem>>
    %65 = tpu.memref_slice %arg7[%c4_i32_40] : memref<16x!tpu.dma_semaphore, #tpu.memory_space<semaphore_mem>> -> memref<1x!tpu.dma_semaphore, #tpu.memory_space<semaphore_mem>>
    %66 = tpu.memref_squeeze %65 : memref<1x!tpu.dma_semaphore, #tpu.memory_space<semaphore_mem>> -> memref<!tpu.dma_semaphore, #tpu.memory_space<semaphore_mem>>
    tpu.enqueue_dma source(%63 : memref<1x64xf32, #tpu.memory_space<any>>) target(%64 : memref<1x64xf32, #tpu.memory_space<vmem>>) target_semaphore(%66 : memref<!tpu.dma_semaphore, #tpu.memory_space<semaphore_mem>>)
    %c0_i32_44 = arith.constant 0 : i32
    %67 = arith.addi %0, %c0_i32_44 : i32
    %c8_i32_45 = arith.constant 8 : i32
    %68 = arith.muli %67, %c8_i32_45 : i32
    %c5_i32 = arith.constant 5 : i32
    %69 = arith.addi %1, %c5_i32 : i32
    %70 = arith.addi %68, %69 : i32
    %c15_i32_46 = arith.constant 15 : i32
    %71 = arith.minsi %70, %c15_i32_46 : i32
    %72 = arith.index_cast %71 : i32 to index
    %73 = memref.load %arg2[%72] : memref<16xi32, #tpu.memory_space<smem>>
    %c0_i32_47 = arith.constant 0 : i32
    %74 = arith.maxsi %73, %c0_i32_47 : i32
    %c49999_i32_48 = arith.constant 49999 : i32
    %75 = arith.minsi %74, %c49999_i32_48 : i32
    %c5_i32_49 = arith.constant 5 : i32
    %c0_i32_50 = arith.constant 0 : i32
    %76 = tpu.memref_slice %arg3[%75, %c0_i32_50] : memref<50000x64xf32, #tpu.memory_space<any>> -> memref<1x64xf32, #tpu.memory_space<any>>
    %c5_i32_51 = arith.constant 5 : i32
    %c0_i32_52 = arith.constant 0 : i32
    %77 = tpu.memref_slice %arg6[%c5_i32_51, %c0_i32_52] : memref<8x64xf32, #tpu.memory_space<vmem>> -> memref<1x64xf32, #tpu.memory_space<vmem>>
    %78 = tpu.memref_slice %arg7[%c5_i32_49] : memref<16x!tpu.dma_semaphore, #tpu.memory_space<semaphore_mem>> -> memref<1x!tpu.dma_semaphore, #tpu.memory_space<semaphore_mem>>
    %79 = tpu.memref_squeeze %78 : memref<1x!tpu.dma_semaphore, #tpu.memory_space<semaphore_mem>> -> memref<!tpu.dma_semaphore, #tpu.memory_space<semaphore_mem>>
    tpu.enqueue_dma source(%76 : memref<1x64xf32, #tpu.memory_space<any>>) target(%77 : memref<1x64xf32, #tpu.memory_space<vmem>>) target_semaphore(%79 : memref<!tpu.dma_semaphore, #tpu.memory_space<semaphore_mem>>)
    %c0_i32_53 = arith.constant 0 : i32
    %80 = arith.addi %0, %c0_i32_53 : i32
    %c8_i32_54 = arith.constant 8 : i32
    %81 = arith.muli %80, %c8_i32_54 : i32
    %c6_i32 = arith.constant 6 : i32
    %82 = arith.addi %1, %c6_i32 : i32
    %83 = arith.addi %81, %82 : i32
    %c15_i32_55 = arith.constant 15 : i32
    %84 = arith.minsi %83, %c15_i32_55 : i32
    %85 = arith.index_cast %84 : i32 to index
    %86 = memref.load %arg2[%85] : memref<16xi32, #tpu.memory_space<smem>>
    %c0_i32_56 = arith.constant 0 : i32
    %87 = arith.maxsi %86, %c0_i32_56 : i32
    %c49999_i32_57 = arith.constant 49999 : i32
    %88 = arith.minsi %87, %c49999_i32_57 : i32
    %c6_i32_58 = arith.constant 6 : i32
    %c0_i32_59 = arith.constant 0 : i32
    %89 = tpu.memref_slice %arg3[%88, %c0_i32_59] : memref<50000x64xf32, #tpu.memory_space<any>> -> memref<1x64xf32, #tpu.memory_space<any>>
    %c6_i32_60 = arith.constant 6 : i32
    %c0_i32_61 = arith.constant 0 : i32
    %90 = tpu.memref_slice %arg6[%c6_i32_60, %c0_i32_61] : memref<8x64xf32, #tpu.memory_space<vmem>> -> memref<1x64xf32, #tpu.memory_space<vmem>>
    %91 = tpu.memref_slice %arg7[%c6_i32_58] : memref<16x!tpu.dma_semaphore, #tpu.memory_space<semaphore_mem>> -> memref<1x!tpu.dma_semaphore, #tpu.memory_space<semaphore_mem>>
    %92 = tpu.memref_squeeze %91 : memref<1x!tpu.dma_semaphore, #tpu.memory_space<semaphore_mem>> -> memref<!tpu.dma_semaphore, #tpu.memory_space<semaphore_mem>>
    tpu.enqueue_dma source(%89 : memref<1x64xf32, #tpu.memory_space<any>>) target(%90 : memref<1x64xf32, #tpu.memory_space<vmem>>) target_semaphore(%92 : memref<!tpu.dma_semaphore, #tpu.memory_space<semaphore_mem>>)
    %c0_i32_62 = arith.constant 0 : i32
    %93 = arith.addi %0, %c0_i32_62 : i32
    %c8_i32_63 = arith.constant 8 : i32
    %94 = arith.muli %93, %c8_i32_63 : i32
    %c7_i32 = arith.constant 7 : i32
    %95 = arith.addi %1, %c7_i32 : i32
    %96 = arith.addi %94, %95 : i32
    %c15_i32_64 = arith.constant 15 : i32
    %97 = arith.minsi %96, %c15_i32_64 : i32
    %98 = arith.index_cast %97 : i32 to index
    %99 = memref.load %arg2[%98] : memref<16xi32, #tpu.memory_space<smem>>
    %c0_i32_65 = arith.constant 0 : i32
    %100 = arith.maxsi %99, %c0_i32_65 : i32
    %c49999_i32_66 = arith.constant 49999 : i32
    %101 = arith.minsi %100, %c49999_i32_66 : i32
    %c7_i32_67 = arith.constant 7 : i32
    %c0_i32_68 = arith.constant 0 : i32
    %102 = tpu.memref_slice %arg3[%101, %c0_i32_68] : memref<50000x64xf32, #tpu.memory_space<any>> -> memref<1x64xf32, #tpu.memory_space<any>>
    %c7_i32_69 = arith.constant 7 : i32
    %c0_i32_70 = arith.constant 0 : i32
    %103 = tpu.memref_slice %arg6[%c7_i32_69, %c0_i32_70] : memref<8x64xf32, #tpu.memory_space<vmem>> -> memref<1x64xf32, #tpu.memory_space<vmem>>
    %104 = tpu.memref_slice %arg7[%c7_i32_67] : memref<16x!tpu.dma_semaphore, #tpu.memory_space<semaphore_mem>> -> memref<1x!tpu.dma_semaphore, #tpu.memory_space<semaphore_mem>>
    %105 = tpu.memref_squeeze %104 : memref<1x!tpu.dma_semaphore, #tpu.memory_space<semaphore_mem>> -> memref<!tpu.dma_semaphore, #tpu.memory_space<semaphore_mem>>
    tpu.enqueue_dma source(%102 : memref<1x64xf32, #tpu.memory_space<any>>) target(%103 : memref<1x64xf32, #tpu.memory_space<vmem>>) target_semaphore(%105 : memref<!tpu.dma_semaphore, #tpu.memory_space<semaphore_mem>>)
    %c0_i32_71 = arith.constant 0 : i32
    %c8_i32_72 = arith.constant 8 : i32
    %106 = arith.addi %c0_i32_71, %c8_i32_72 : i32
    %c1_i32_73 = arith.constant 1 : i32
    scf.for %arg8 = %c0_i32_71 to %106 step %c1_i32_73  : i32 {
      %c16_i32 = arith.constant 16 : i32
      %c0_i32_81 = arith.constant 0 : i32
      %113 = arith.cmpi eq, %c16_i32, %c0_i32_81 : i32
      %c1_i32_82 = arith.constant 1 : i32
      %114 = arith.select %113, %c1_i32_82, %c16_i32 : i32
      %115 = arith.remsi %arg8, %114 : i32
      %c0_i32_83 = arith.constant 0 : i32
      %116 = arith.cmpi ne, %115, %c0_i32_83 : i32
      %c0_i32_84 = arith.constant 0 : i32
      %117 = arith.cmpi slt, %115, %c0_i32_84 : i32
      %c0_i32_85 = arith.constant 0 : i32
      %118 = arith.cmpi slt, %114, %c0_i32_85 : i32
      %119 = arith.xori %117, %118 : i1
      %120 = arith.andi %119, %116 : i1
      %121 = arith.addi %115, %114 : i32
      %122 = arith.select %120, %121, %115 : i32
      %c0_i32_86 = arith.constant 0 : i32
      %c0_i32_87 = arith.constant 0 : i32
      %123 = tpu.memref_slice %arg3[%c0_i32_86, %c0_i32_87] : memref<50000x64xf32, #tpu.memory_space<any>> -> memref<1x64xf32, #tpu.memory_space<any>>
      %c0_i32_88 = arith.constant 0 : i32
      %124 = tpu.memref_slice %arg6[%arg8, %c0_i32_88] : memref<8x64xf32, #tpu.memory_space<vmem>> -> memref<1x64xf32, #tpu.memory_space<vmem>>
      %125 = tpu.memref_slice %arg7[%122] : memref<16x!tpu.dma_semaphore, #tpu.memory_space<semaphore_mem>> -> memref<1x!tpu.dma_semaphore, #tpu.memory_space<semaphore_mem>>
      %126 = tpu.memref_squeeze %125 : memref<1x!tpu.dma_semaphore, #tpu.memory_space<semaphore_mem>> -> memref<!tpu.dma_semaphore, #tpu.memory_space<semaphore_mem>>
      tpu.wait_dma2 semaphore(%126 : memref<!tpu.dma_semaphore, #tpu.memory_space<semaphore_mem>>) src(%123 : memref<1x64xf32, #tpu.memory_space<any>>) dst(%124 : memref<1x64xf32, #tpu.memory_space<vmem>>)
    }
    %c8_i32_74 = arith.constant 8 : i32
    %c0 = arith.constant 0 : index
    %c0_75 = arith.constant 0 : index
    %107 = vector.load %arg6[%c0, %c0_75] : memref<8x64xf32, #tpu.memory_space<vmem>>, vector<8x64xf32>
    %108 = vector.shape_cast %107 : vector<8x64xf32> to vector<1x8x64xf32>
    %c0_76 = arith.constant 0 : index
    %c0_77 = arith.constant 0 : index
    %109 = vector.load %arg4[%c0_76, %c0_77] : memref<8x64xf32, #tpu.memory_space<vmem>>, vector<8x64xf32>
    %110 = vector.shape_cast %109 : vector<8x64xf32> to vector<1x8x64xf32>
    %111 = arith.addf %108, %110 : vector<1x8x64xf32>
    %c0_78 = arith.constant 0 : index
    %c0_79 = arith.constant 0 : index
    %c0_80 = arith.constant 0 : index
    %112 = vector.load %arg5[%c0_78, %c0_79, %c0_80] : memref<1x8x64xf32, #tpu.memory_space<vmem>>, vector<1x8x64xf32>
    tpu.vector_store %arg5[%c0_78, %c0_79, %c0_80], %111 {strides = array<i32>} : memref<1x8x64xf32, #tpu.memory_space<vmem>>, vector<1x8x64xf32>,
    return
  }
  func.func @transform_1(%arg0: i32, %arg1: i32, %arg2: memref<16xi32, #tpu.memory_space<smem>>) -> (i32, i32) {
    %c0_i32 = arith.constant 0 : i32
    %c0_i32_0 = arith.constant 0 : i32
    return %arg1, %c0_i32 : i32, i32
  }
  func.func @transform_2(%arg0: i32, %arg1: i32, %arg2: memref<16xi32, #tpu.memory_space<smem>>) -> (i32, i32, i32) {
    %c0_i32 = arith.constant 0 : i32
    %c0_i32_0 = arith.constant 0 : i32
    return %arg0, %arg1, %c0_i32 : i32, i32, i32
  }
}

</mosaic_0001>

<bundles_post_ra>
// kernel: tpu_custom_call.1
= control target key start
LH: loop header
LB: loop body
LE: loop exit
PB: predicated region body
PF: predicated region fallthrough
CT: control target
= control target key end

     0   :  { %s1342_s0 = inlined_call_operand.vmem [shape: s32[16], index: 0, kind: input, shape index: {}]   ;;  %s1343_s1 = inlined_call_operand.vmem [shape: f32[50000,64], index: 1, kind: input, shape index: {}]   ;;  %s1344_s2 = inlined_call_operand.vmem [shape: f32[8,64], index: 2, kind: input, shape index: {}]   ;;  %s1345_s3 = inlined_call_operand.hbm [shape: f32[2,8,64], index: 3, kind: output, shape index: {}]  }
   0x1   :  { %s8_s14 = sshll.u32 %s1342_s0, 4  ;;  %s9_s14 = int_to_ptr.vmem [resolvable:$true] %s8_s14 }
   0x2   :  { %s1056_s15 = scalar_lea.vmem %s9_s14, 16  ;;  %p1061_p1 = scmp.lt.s32.totalorder %s9_s14, %s9_s14 }
   0x3   :  { %p1057_p0 = scmp.ne.s32.totalorder %s9_s14, %s1056_s15  ;;  %p1062_p2 = scmp.lt.s32.totalorder %s1056_s15, %s1056_s15 }
   0x5   :  { %p1063_p3 = por %p1062_p2, %p1061_p1 }
   0x7   :  { %p1064_p4 = pnand %p1063_p3, %p1057_p0 }
   0x9   :  { %1067 = shalt.err (!%p1064_p4)  }
   0xa   :  { %s1160_s16 = smov [#allocation5]  }
   0xb   :  { %11 = dma.vmem_to_smem %s9_s14, 16, %s1160_s16, [#allocation4] }
   0xc   :  { %1124 = dma.done.wait [#allocation4], 16 }
   0xd   :  { %1125 = vsyncadd [#allocation4], 4294967280 }
   0xe   :  { %13 = sfence }
   0xf   :  { %14 = vsyncpa [#allocation7], 0 }
  0x10   :  { %16 = vsyncpa [#allocation7 + $0x1], 0  ;;  %s1185_s17 = smov 0   ;;  %s1187_s18 = smov 0  }
  0x11   :  { %s1189_s0 = smov 0   ;;  %s1191_s19 = smov 0  }
  0x12   :  { %s1193_s20 = smov 0   ;;  %s1195_s21 = smov 0  }
  0x13 LB: > { %s906_s22 = sadd.s32 4294967295, %s1154_s21   ;;  %s907_s23 = sadd.s32 4294967294, %s1154_s21   ;;  %s1154_s21 = sphi %s1195_s21, %s22_s21   ;;  %s1150_s20 = sphi %s1193_s20, %s1352_s20   ;;  %s1146_s19 = sphi %s1191_s19, %s1351_s19   ;;  %s1142_s0 = sphi %s1189_s0, %s1350_s0   ;;  %s1138_s18 = sphi %s1187_s18, %s1349_s18   ;;  %s1134_s17 = sphi %s1185_s17, %s1348_s17  }
  0x14   : > { %s34_s24 = sadd.s32 1, %s1150_s20  ;;  %s69_s25 = sadd.s32 1, %s1142_s0 }
  0x15   : > { %p36_p5 = scmp.ge.s32.totalorder %s34_s24, 2  ;;  %p79_p6 = scmp.ne.s32.totalorder %s1142_s0, %s1138_s18 }
  0x16   : > { %p80_p7 = scmp.eq.s32.totalorder %s906_s22, 1  ;;  %p85_p8 = scmp.ne.s32.totalorder %s1138_s18, %s1134_s17 }
  0x17   : > { %s1354_s24 = smov (%p36_p5, %s34_s24), 0  ;;  %p86_p10 = scmp.eq.s32.totalorder %s907_s23, 1 }
  0x18   : > { %p1225_p9 = por %p80_p7, %p79_p6  ;;  %s64_s27 = ssub.s32 %s1150_s20, %s1354_s24 }
  0x19   : > { %p910_p11 = scmp.ge.s32.totalorder %s1154_s21, 1  ;;  %p67_p12 = scmp.eq.s32.totalorder %s64_s27, 0 }
  0x1a   : > { %p1232_p13 = por %p86_p10, %p85_p8  ;;  %p111_p0 = scmp.lt.s32.totalorder %s1154_s21, 3 }
  0x1b   : > { %s1238_s29 = scalar_select %p67_p12, %s1142_s0, %s69_s25  }
  0x1c   : > { %p112_p1 = pnand %p910_p11, %p111_p0 }
  0x1d   : > { %s127_s30 = sand.u32 (!%p112_p1), 1, %s1138_s18   ;;  %s1242_s4 = sshll.u32 (!%p112_p1), %s1146_s19, 3 }
  0x1e   : > { %115 = sbr.rel (%p112_p1) target bundleno = 209 (0xd1), region = 24  ;;  %s1246_s5 = sshll.u32 (!%p112_p1), %s127_s30, 3 }
  0x1f   : > { %p137_p2 = scmp.lt.s32.totalorder (!%p112_p1), %s1242_s4, 15  ;;  %s129_s11 = scalar_lea.vmem (!%p112_p1), [#allocation6], %s1246_s5 }
  0x25   : > { %s138_s6 = scalar_select %p137_p2, %s1242_s4, 15 }
  0x27   : > { %s139_s7 = sld [smem:[#allocation5 + %s138_s6]] }
  0x2d   : > { %p140_p3 = scmp.gt.s32.totalorder %s139_s7, 0  ;;  %p913_p4 = scmp.lt.s32.totalorder %s139_s7, 49999 }
  0x2f   : > { %s1356_s7 = smov (!%p140_p3, %s139_s7), 0 }
  0x30   : > { %s1358_s7 = smov (!%p913_p4, %s1356_s7), 49999 }
  0x31   : > { %s144_s10 = scalar_lea.vmem %s1343_s1, %s1358_s7 }
  0x32   : > { %v162_v0 = vld [vmem:[%s144_s10] sm:$0x1] }
  0x33   : > { %163 = vst [vmem:[#allocation2] sm:$0x1] %v162_v0 }
  0x34   : > { %188 = vsyncadd [#allocation3], 16  ;;  %s190_s12 = sadd.s32 1, %s1242_s4 }
  0x35   : > { %p191_p5 = scmp.lt.s32.totalorder %s190_s12, 15 }
  0x37   : > { %s1360_s12 = smov (!%p191_p5, %s190_s12), 15 }
  0x38   : > { %s193_s13 = sld [smem:[#allocation5 + %s1360_s12]] }
  0x3e   : > { %p194_p6 = scmp.gt.s32.totalorder %s193_s13, 0  ;;  %p918_p7 = scmp.lt.s32.totalorder %s193_s13, 49999 }
  0x40   : > { %s1362_s13 = smov (!%p194_p6, %s193_s13), 0 }
  0x41   : > { %s1364_s13 = smov (!%p918_p7, %s1362_s13), 49999 }
  0x42   : > { %s198_s16 = scalar_lea.vmem %s1343_s1, %s1364_s13 }
  0x43   : > { %v218_v1 = vld [vmem:[%s198_s16] sm:$0x1] }
  0x44   : > { %219 = vst [vmem:[#allocation2 + $0x1] sm:$0x1] %v218_v1 }
  0x45   : > { %244 = vsyncadd [#allocation3 + $0x1], 16  ;;  %s246_s22 = sadd.s32 2, %s1242_s4 }
  0x46   : > { %p247_p8 = scmp.lt.s32.totalorder %s246_s22, 15 }
  0x48   : > { %s1366_s22 = smov (!%p247_p8, %s246_s22), 15 }
  0x49   : > { %s249_s23 = sld [smem:[#allocation5 + %s1366_s22]] }
  0x4f   : > { %p250_p10 = scmp.gt.s32.totalorder %s249_s23, 0  ;;  %p923_p11 = scmp.lt.s32.totalorder %s249_s23, 49999 }
  0x51   : > { %s1368_s23 = smov (!%p250_p10, %s249_s23), 0 }
  0x52   : > { %s1370_s23 = smov (!%p923_p11, %s1368_s23), 49999 }
  0x53   : > { %s254_s6 = scalar_lea.vmem %s1343_s1, %s1370_s23 }
  0x54   : > { %v274_v2 = vld [vmem:[%s254_s6] sm:$0x1] }
  0x55   : > { %275 = vst [vmem:[#allocation2 + $0x2] sm:$0x1] %v274_v2 }
  0x56   : > { %300 = vsyncadd [#allocation3 + $0x2], 16  ;;  %s302_s7 = sadd.s32 3, %s1242_s4 }
  0x57   : > { %p303_p12 = scmp.lt.s32.totalorder %s302_s7, 15 }
  0x59   : > { %s1372_s7 = smov (!%p303_p12, %s302_s7), 15 }
  0x5a   : > { %s305_s8 = sld [smem:[#allocation5 + %s1372_s7]] }
  0x60   : > { %p306_p0 = scmp.gt.s32.totalorder %s305_s8, 0  ;;  %p928_p1 = scmp.lt.s32.totalorder %s305_s8, 49999 }
  0x62   : > { %s1374_s8 = smov (!%p306_p0, %s305_s8), 0 }
  0x63   : > { %s1376_s8 = smov (!%p928_p1, %s1374_s8), 49999 }
  0x64   : > { %s310_s12 = scalar_lea.vmem %s1343_s1, %s1376_s8 }
  0x65   : > { %v330_v3 = vld [vmem:[%s310_s12] sm:$0x1] }
  0x66   : > { %331 = vst [vmem:[#allocation2 + $0x3] sm:$0x1] %v330_v3 }
  0x67   : > { %356 = vsyncadd [#allocation3 + $0x3], 16  ;;  %s358_s13 = sadd.s32 4, %s1242_s4 }
  0x68   : > { %p359_p2 = scmp.lt.s32.totalorder %s358_s13, 15 }
  0x6a   : > { %s1378_s13 = smov (!%p359_p2, %s358_s13), 15 }
  0x6b   : > { %s361_s14 = sld [smem:[#allocation5 + %s1378_s13]] }
  0x71   : > { %p362_p3 = scmp.gt.s32.totalorder %s361_s14, 0  ;;  %p933_p4 = scmp.lt.s32.totalorder %s361_s14, 49999 }
  0x73   : > { %s1380_s14 = smov (!%p362_p3, %s361_s14), 0 }
  0x74   : > { %s1382_s14 = smov (!%p933_p4, %s1380_s14), 49999 }
  0x75   : > { %s366_s22 = scalar_lea.vmem %s1343_s1, %s1382_s14 }
  0x76   : > { %v386_v4 = vld [vmem:[%s366_s22] sm:$0x1] }
  0x77   : > { %387 = vst [vmem:[#allocation2 + $0x4] sm:$0x1] %v386_v4 }
  0x78   : > { %412 = vsyncadd [#allocation3 + $0x4], 16  ;;  %s414_s23 = sadd.s32 5, %s1242_s4 }
  0x79   : > { %p415_p5 = scmp.lt.s32.totalorder %s414_s23, 15 }
  0x7b   : > { %s1384_s23 = smov (!%p415_p5, %s414_s23), 15 }
  0x7c   : > { %s417_s25 = sld [smem:[#allocation5 + %s1384_s23]] }
  0x82   : > { %p418_p6 = scmp.gt.s32.totalorder %s417_s25, 0  ;;  %p938_p7 = scmp.lt.s32.totalorder %s417_s25, 49999 }
  0x84   : > { %s1386_s25 = smov (!%p418_p6, %s417_s25), 0 }
  0x85   : > { %s1388_s25 = smov (!%p938_p7, %s1386_s25), 49999 }
  0x86   : > { %s422_s7 = scalar_lea.vmem %s1343_s1, %s1388_s25 }
  0x87   : > { %v442_v5 = vld [vmem:[%s422_s7] sm:$0x1] }
  0x88   : > { %443 = vst [vmem:[#allocation2 + $0x5] sm:$0x1] %v442_v5 }
  0x89   : > { %468 = vsyncadd [#allocation3 + $0x5], 16  ;;  %s470_s8 = sadd.s32 6, %s1242_s4 }
  0x8a   : > { %p471_p8 = scmp.lt.s32.totalorder %s470_s8, 15 }
  0x8c   : > { %s1390_s8 = smov (!%p471_p8, %s470_s8), 15 }
  0x8d   : > { %s473_s9 = sld [smem:[#allocation5 + %s1390_s8]] }
  0x93   : > { %p474_p10 = scmp.gt.s32.totalorder %s473_s9, 0  ;;  %p943_p11 = scmp.lt.s32.totalorder %s473_s9, 49999 }
  0x95   : > { %s1392_s9 = smov (!%p474_p10, %s473_s9), 0 }
  0x96   : > { %s1394_s9 = smov (!%p943_p11, %s1392_s9), 49999 }
  0x97   : > { %s478_s13 = scalar_lea.vmem %s1343_s1, %s1394_s9 }
  0x98   : > { %v498_v6 = vld [vmem:[%s478_s13] sm:$0x1] }
  0x99   : > { %499 = vst [vmem:[#allocation2 + $0x6] sm:$0x1] %v498_v6 }
  0x9a   : > { %524 = vsyncadd [#allocation3 + $0x6], 16  ;;  %s526_s14 = sadd.s32 7, %s1242_s4 }
  0x9b   : > { %p527_p12 = scmp.lt.s32.totalorder %s526_s14, 15 }
  0x9d   : > { %s1396_s14 = smov (!%p527_p12, %s526_s14), 15 }
  0x9e   : > { %s529_s15 = sld [smem:[#allocation5 + %s1396_s14]] }
  0xa4   : > { %p530_p0 = scmp.gt.s32.totalorder %s529_s15, 0  ;;  %p948_p1 = scmp.lt.s32.totalorder %s529_s15, 49999 }
  0xa6   : > { %s1398_s15 = smov (!%p530_p0, %s529_s15), 0 }
  0xa7   : > { %s1400_s15 = smov (!%p948_p1, %s1398_s15), 49999 }
  0xa8   : > { %s534_s23 = scalar_lea.vmem %s1343_s1, %s1400_s15 }
  0xa9   : > { %v554_v7 = vld [vmem:[%s534_s23] sm:$0x1] }
  0xaa   : > { %555 = vst [vmem:[#allocation2 + $0x7] sm:$0x1] %v554_v7 }
  0xab   : > { %580 = vsyncadd [#allocation3 + $0x7], 16  ;;  %s1156_s25 = smov 0  }
  0xac LB: >> { %p587_p2 = scmp.lt.s32.totalorder %s1158_s25, 0  ;;  %s588_s4 = ssub.s32 0, %s1158_s25  ;;  %s1158_s25 = sphi %s1156_s25, %s586_s25  }
  0xad   : >> { %s953_s27 = smin.u32 %s1158_s25, %s588_s4 }
  0xae   : >> { %s590_s6 = sand.u32 15, %s953_s27  }
  0xaf   : >> { %s591_s7 = ssub.s32 0, %s590_s6 }
  0xb0   : >> { %s1402_s7 = smov (!%p587_p2, %s591_s7), %s590_s6 }
  0xb1   : >> { %p955_p3 = scmp.lt.s32.totalorder %s1402_s7, 0  ;;  %s597_s8 = sadd.s32 16, %s1402_s7 }
  0xb3   : >> { %s1404_s8 = smov (!%p955_p3, %s597_s8), %s1402_s7 }
  0xb4   : >> { %s599_s9 = scalar_lea.sflag [#allocation3], %s1404_s8 }
  0xb5   : >> { %1126 = dma.done.wait %s599_s9, 16 }
  0xb6   : >> { %1127 = vsyncadd %s599_s9, 4294967280  ;;  %s586_s25 = sadd.s32 1, %s1158_s25  }
  0xb7   : >> { %p583_p4 = scmp.ge.s32.totalorder %s586_s25, 8  }
  0xb8   : > { %v603_v8 = vld [vmem:[#allocation2] sm:$0xff] (%p583_p4)  ;;  %v604_v9 = vld [vmem:[%s1344_s2] sm:$0xff] (%p583_p4)  ;;  %vm606_vm0 = vcmask (%p583_p4), 523264   ;;  %s957_s13 = sshll.u32 (%p583_p4), %s1146_s19, 7  ;;  %s623_s22 = sshll.u32 (%p583_p4), %s129_s11, 4  ;;  %s1293_s22 = int_to_ptr.vmem [resolvable:$true] %s623_s22 }
  0xb9   : > { %585 = sbr.rel (!%p583_p4) target bundleno = 172 (0xac), region = 424  ;;  %v605_v10 = vadd.f32 (%p583_p4), %v604_v9, %v603_v8  ;;  %s1289_s16 = scalar_lea.hbm (%p583_p4), %s1345_s3, %s957_s13 }
  0xba   : > { %s609_s23 = scalar_lea.sflag (%p583_p4), [#allocation7], %s127_s30  ;;  %s1068_s25 = scalar_lea.vmem (%p583_p4), %s1293_s22, 128 }
  0xbb   : > { %607 = vst.msk [vmem:[%s129_s11] sm:$0xff] (%p583_p4), %vm606_vm0, %v605_v10  ;;  %p1069_p5 = scmp.ne.s32.totalorder (%p583_p4), %s1293_s22, %s1068_s25  ;;  %s1161_s19 = smov (%p583_p4), [#allocation6]  }
  0xbc   : > { %s1072_s4 = sshll.u32 (%p583_p4), %s1161_s19, 4  ;;  %s1073_s4 = int_to_ptr.vmem [resolvable:$false] %s1072_s4 }
  0xbd   : > { %p1070_p6 = pnand (%p583_p4), %p1069_p5, %p1225_p9  ;;  %s1074_s27 = scalar_lea.vmem (%p583_p4), %s1073_s4, 256 }
  0xbe   : > { %p1075_p8 = scmp.lt.s32.totalorder (%p583_p4), %s1293_s22, %s1073_s4  ;;  %p1076_p10 = scmp.lt.s32.totalorder (%p583_p4), %s1074_s27, %s1068_s25 }
  0xbf   : > { %p1071_p7 = pneg (%p583_p4), %p1070_p6 }
  0xc0   : > { %p1077_p11 = por %p1076_p10, %p1075_p8 }
  0xc2   : > { %p1078_p12 = pnand %p1077_p11, %p1071_p7 }
  0xc4   : > { %1081 = shalt.err (!%p1078_p12)
}
  0xc5   : > { %s1082_s30 = scalar_lea.hbm %s1289_s16, 128  ;;  %s1086_s6 = scalar_lea.hbm %s1345_s3, 256 }
  0xc6   : > { %p1083_p0 = scmp.ne.s32.totalorder %s1289_s16, %s1082_s30  ;;  %p1087_p3 = scmp.lt.u32.totalorder %s1289_s16, %s1345_s3 }
  0xc7   : > { %p1088_p4 = scmp.lt.u32.totalorder %s1086_s6, %s1082_s30  ;;  %p1090_p6 = scmp.lt.u32.totalorder %s1082_s30, %s1289_s16 }
  0xc8   : > { %p1084_p1 = pnand %p1083_p0, %p1225_p9 }
  0xc9   : > { %p1089_p5 = por %p1088_p4, %p1087_p3 }
  0xca   : > { %p1085_p2 = pneg %p1084_p1 }
  0xcb   : > { %p1091_p7 = por %p1090_p6, %p1089_p5 }
  0xcd   : > { %p1092_p8 = pnand %p1091_p7, %p1085_p2 }
  0xcf   : > { %1095 = shalt.err (!%p1092_p8)
}
  0xd0   : > { %992 = dma.vmem_to_hbm [thread:$0]  (%p1225_p9), %s1293_s22, 128, %s1289_s16, %s609_s23  }
  0xd1 PF: > { %p998_p10 = scmp.ge.s32.totalorder %s1154_s21, 2  ;;  %s635_s9 = sand.u32 1, %s1134_s17  }
  0xd2   : > { %s636_s10 = scalar_lea.sflag [#allocation7], %s635_s9 }
  0xd3   : > { %p995_p11 = pnand %p998_p10, %p1232_p13 }
  0xd5   : > { %1129 = dma.done.wait (!%p995_p11), %s636_s10, 128  }
  0xd6   : > { %1131 = vsyncadd (!%p995_p11), %s636_s10, 4294967168  ;;  %s22_s21 = sadd.s32 1, %s1154_s21   ;;  %s1348_s17 = smov %s1138_s18 }
  0xd7   : > { %p19_p12 = scmp.ge.s32.totalorder %s22_s21, 4   ;;  %s1349_s18 = smov %s1142_s0 }
  0xd8   : > { %s1350_s0 = smov %s1238_s29  ;;  %s1351_s19 = smov %s1150_s20 }
  0xd9   : > { %s1352_s20 = smov %s1354_s24  ;;  %21 = sbr.rel (!%p19_p12) target bundleno = 19 (0x13), region = 435 }
  0xe0   :  { %641 = vsyncpa [#allocation7], 1 }
  0xe1   :  { %643 = vsyncpa [#allocation7 + $0x1], 1 }
  0xe2   :  { %644 = vsyncmov [#allocation3] }
  0xe5   :  { %s645_s26 = vpop.sfrf %644 }
  0xe6   :  { %p960_p9 = scmp.ne.s32.totalorder %s645_s26, 0 }
  0xe8   :  { %649 = shalt.err (%p960_p9)  }
  0xe9   :  { %651 = vsyncmov [#allocation3 + $0x1] }
  0xec   :  { %s652_s28 = vpop.sfrf %651 }
  0xed   :  { %p961_p13 = scmp.ne.s32.totalorder %s652_s28, 0 }
  0xef   :  { %656 = shalt.err (%p961_p13)  }
  0xf0   :  { %658 = vsyncmov [#allocation3 + $0x2] }
  0xf3   :  { %s659_s12 = vpop.sfrf %658 }
  0xf4   :  { %p962_p0 = scmp.ne.s32.totalorder %s659_s12, 0 }
  0xf6   :  { %663 = shalt.err (%p962_p0)  }
  0xf7   :  { %665 = vsyncmov [#allocation3 + $0x3] }
  0xfa   :  { %s666_s29 = vpop.sfrf %665 }
  0xfb   :  { %p963_p1 = scmp.ne.s32.totalorder %s666_s29, 0 }
  0xfd   :  { %670 = shalt.err (%p963_p1)  }
  0xfe   :  { %672 = vsyncmov [#allocation3 + $0x4] }
 0x101   :  { %s673_s21 = vpop.sfrf %672 }
 0x102   :  { %p964_p2 = scmp.ne.s32.totalorder %s673_s21, 0 }
 0x104   :  { %677 = shalt.err (%p964_p2)  }
 0x105   :  { %679 = vsyncmov [#allocation3 + $0x5] }
 0x108   :  { %s680_s1 = vpop.sfrf %679 }
 0x109   :  { %p965_p3 = scmp.ne.s32.totalorder %s680_s1, 0 }
 0x10b   :  { %684 = shalt.err (%p965_p3)  }
 0x10c   :  { %686 = vsyncmov [#allocation3 + $0x6] }
 0x10f   :  { %s687_s2 = vpop.sfrf %686 }
 0x110   :  { %p966_p4 = scmp.ne.s32.totalorder %s687_s2, 0 }
 0x112   :  { %691 = shalt.err (%p966_p4)  }
 0x113   :  { %693 = vsyncmov [#allocation3 + $0x7] }
 0x116   :  { %s694_s3 = vpop.sfrf %693 }
 0x117   :  { %p967_p5 = scmp.ne.s32.totalorder %s694_s3, 0 }
 0x119   :  { %698 = shalt.err (%p967_p5)  }
 0x11a   :  { %700 = vsyncmov [#allocation3 + $0x8] }
 0x11d   :  { %s701_s17 = vpop.sfrf %700 }
 0x11e   :  { %p968_p6 = scmp.ne.s32.totalorder %s701_s17, 0 }
 0x120   :  { %705 = shalt.err (%p968_p6)  }
 0x121   :  { %707 = vsyncmov [#allocation3 + $0x9] }
 0x124   :  { %s708_s18 = vpop.sfrf %707 }
 0x125   :  { %p969_p7 = scmp.ne.s32.totalorder %s708_s18, 0 }
 0x127   :  { %712 = shalt.err (%p969_p7)  }
 0x128   :  { %714 = vsyncmov [#allocation3 + $0xa] }
 0x12b   :  { %s715_s0 = vpop.sfrf %714 }
 0x12c   :  { %p970_p8 = scmp.ne.s32.totalorder %s715_s0, 0 }
 0x12e   :  { %719 = shalt.err (%p970_p8)  }
 0x12f   :  { %721 = vsyncmov [#allocation3 + $0xb] }
 0x132   :  { %s722_s20 = vpop.sfrf %721 }
 0x133   :  { %p971_p10 = scmp.ne.s32.totalorder %s722_s20, 0 }
 0x135   :  { %726 = shalt.err (%p971_p10)  }
 0x136   :  { %728 = vsyncmov [#allocation3 + $0xc] }
 0x139   :  { %s729_s24 = vpop.sfrf %728 }
 0x13a   :  { %p972_p11 = scmp.ne.s32.totalorder %s729_s24, 0 }
 0x13c   :  { %733 = shalt.err (%p972_p11)  }
 0x13d   :  { %735 = vsyncmov [#allocation3 + $0xd] }
 0x140   :  { %s736_s13 = vpop.sfrf %735 }
 0x141   :  { %p973_p12 = scmp.ne.s32.totalorder %s736_s13, 0 }
 0x143   :  { %740 = shalt.err (%p973_p12)  }
 0x144   :  { %742 = vsyncmov [#allocation3 + $0xe] }
 0x147   :  { %s743_s14 = vpop.sfrf %742 }
 0x148   :  { %p974_p9 = scmp.ne.s32.totalorder %s743_s14, 0 }
 0x14a   :  { %747 = shalt.err (%p974_p9)  }
 0x14b   :  { %749 = vsyncmov [#allocation3 + $0xf] }
 0x14e   :  { %s750_s15 = vpop.sfrf %749 }
 0x14f   :  { %p975_p13 = scmp.ne.s32.totalorder %s750_s15, 0 }
 0x151   :  { %754 = shalt.err (%p975_p13)  }

</bundles_post_ra>
